<compile_context>
chip_gen: v7x
topology: tpu7x:2x2x1
jax: 0.10.0
libtpu: 0.0.40
codegen_flags: <defaults>
</compile_context>

<pallas_src>
import math
import jax
import jax.numpy as jnp
from jax.experimental import pallas as pl
from jax.experimental.pallas import tpu as pltpu

# --- model hyperparameters (small, consistent with the module) ---
B, S, E = 2, 8, 32
BS = B * S
NUM_HEADS = 4
NUM_KV_HEADS = 2
HEAD_DIM = E // NUM_HEADS            # 8
GROUP = NUM_HEADS // NUM_KV_HEADS    # 2  (kv_group_size)
KV_E = E // GROUP                    # 16 (k/v projection width)
QKV_W = E + 2 * KV_E                 # 64 (fused q|k|v projection width)
FFN = 4 * E                          # 128 (ffn_dim)
EPS = 1e-8
INV_E = 1.0 / E
NEG_INF = -1e30


def decoder_kernel(x_ref, wqkv_ref, wo_ref, w1_ref, w2_ref, mask_ref,
                   bqkv_ref, bo_ref, b1_ref, b2_ref, g1_ref, g2_ref, o_ref):
    x2 = x_ref[...]                                           # (BS, E)

    # ---------------- fused QKV projection ----------------
    # (1/sqrt(head_dim) already folded into the Q columns / bias host-side)
    qkv = jnp.dot(x2, wqkv_ref[...],
                  preferred_element_type=jnp.float32) + bqkv_ref[...]   # (BS, 64)
    qkv3 = qkv.reshape(B, S, QKV_W)                           # (2, 8, 64)

    # ---------------- Grouped Query Attention (fully batched) ----------------
    # Stack heads along the leading axis -> (H*B, S, D); K/V use kv = h//GROUP
    # (repeat_interleave semantics).  One batched scores pass, one masked
    # softmax, one batched PV pass for all heads.
    q_all = jnp.concatenate(
        [qkv3[:, :, h * HEAD_DIM:(h + 1) * HEAD_DIM] for h in range(NUM_HEADS)],
        axis=0)                                               # (H*B, S, D)
    k_all = jnp.concatenate(
        [qkv3[:, :, E + (h // GROUP) * HEAD_DIM:E + (h // GROUP + 1) * HEAD_DIM]
         for h in range(NUM_HEADS)], axis=0)                  # (H*B, S, D)
    v_all = jnp.concatenate(
        [qkv3[:, :, E + KV_E + (h // GROUP) * HEAD_DIM:
              E + KV_E + (h // GROUP + 1) * HEAD_DIM]
         for h in range(NUM_HEADS)], axis=0)                  # (H*B, S, D)

    s = jnp.einsum("bqd,bkd->bqk", q_all, k_all,
                   preferred_element_type=jnp.float32)        # (H*B, S, S)
    s = s + mask_ref[...]                                     # additive causal mask
    m = jnp.max(s, axis=-1, keepdims=True)
    e = jnp.exp(s - m)
    p = e * pl.reciprocal(jnp.sum(e, axis=-1, keepdims=True), approx=True)
    # attention dropout is identity at inference (eval mode)
    o_all = jnp.einsum("bqk,bkd->bqd", p, v_all,
                       preferred_element_type=jnp.float32)    # (H*B, S, D)

    # reassemble heads along lanes -> (BS, E), then ONE output projection dot
    attn_in = jnp.concatenate(
        [o_all[h * B:(h + 1) * B].reshape(BS, HEAD_DIM) for h in range(NUM_HEADS)],
        axis=-1)                                              # (BS, E)
    attn = jnp.dot(attn_in, wo_ref[...],
                   preferred_element_type=jnp.float32) + bo_ref[...]     # (BS, E)

    # ---------------- residual + RMSNorm 1 ----------------
    # (eps inside the sqrt vs. outside in PyTorch — negligible at eps=1e-8)
    h1 = x2 + attn
    h1 = g1_ref[...] * (h1 * jax.lax.rsqrt(
        jnp.sum(h1 * h1, axis=-1, keepdims=True) * INV_E + EPS))

    # ---------------- FeedForward with SwiGLU ----------------
    u = jnp.dot(h1, w1_ref[...],
                preferred_element_type=jnp.float32) + b1_ref[...]        # (BS, 256)
    a = u[:, :FFN]
    g = u[:, FFN:]
    silu_a = a * pl.reciprocal(1.0 + jnp.exp(-a), approx=True)
    ff = jnp.dot(silu_a * g, w2_ref[...],
                 preferred_element_type=jnp.float32) + b2_ref[...]       # (BS, E)

    # ---------------- residual + RMSNorm 2 ----------------
    h2 = h1 + ff
    o_ref[...] = g2_ref[...] * (h2 * jax.lax.rsqrt(
        jnp.sum(h2 * h2, axis=-1, keepdims=True) * INV_E + EPS))


def pack_params(p):
    """Fuse QKV with the 1/sqrt(head_dim) score scale folded into Q."""
    scale = 1.0 / math.sqrt(HEAD_DIM)
    wqkv = jnp.concatenate([p["wq"] * scale, p["wk"], p["wv"]], axis=1)   # (E, 64)
    bqkv = jnp.concatenate([p["bq"] * scale, p["bk"], p["bv"]], axis=1)   # (1, 64)
    return wqkv, bqkv


def decoder_forward(x, params):
    wqkv, bqkv = pack_params(params)
    # additive causal mask, precomputed host-side: 0 where allowed, -1e30 where masked
    mask_add = jnp.where(jnp.tril(jnp.ones((S, S), bool)), 0.0, NEG_INF)
    mask_add = mask_add.astype(jnp.float32)[None]             # (1, S, S)
    x2 = x.reshape(BS, E)                                     # free layout no-op

    vmem = pl.BlockSpec(memory_space=pltpu.MemorySpace.VMEM)
    out2 = pl.pallas_call(
        decoder_kernel,
        out_shape=jax.ShapeDtypeStruct((BS, E), jnp.float32),
        in_specs=[vmem] * 12,
        out_specs=vmem,
    )(x2, wqkv, params["wo"], params["w1"], params["w2"], mask_add,
      bqkv, params["bo"], params["b1"], params["b2"], params["g1"], params["g2"])
    return out2.reshape(B, S, E)


def init_params(key):
    ks = jax.random.split(key, 6)

    def lin(k, fan_in, fan_out):
        kw, kb = jax.random.split(k)
        bound = 1.0 / math.sqrt(fan_in)
        w = jax.random.uniform(kw, (fan_in, fan_out), jnp.float32, -bound, bound)
        b = jax.random.uniform(kb, (1, fan_out), jnp.float32, -bound, bound)
        return w, b

    wq, bq = lin(ks[0], E, E)
    wk, bk = lin(ks[1], E, KV_E)
    wv, bv = lin(ks[2], E, KV_E)
    wo, bo = lin(ks[3], E, E)
    w1, b1 = lin(ks[4], E, 2 * FFN)
    w2, b2 = lin(ks[5], FFN, E)
    g1 = jnp.ones((1, E), jnp.float32)   # RMSNorm weights init to ones
    g2 = jnp.ones((1, E), jnp.float32)
    return dict(wq=wq, bq=bq, wk=wk, bk=bk, wv=wv, bv=bv, wo=wo, bo=bo,
                g1=g1, w1=w1, b1=b1, w2=w2, b2=b2, g2=g2)


def decoder_reference(x, p):
    """Pure-JAX reference mirroring the PyTorch forward (eval mode)."""
    def lin(v, w, b):
        return v @ w + b

    q = lin(x, p["wq"], p["bq"]).reshape(B, S, NUM_HEADS, HEAD_DIM).transpose(0, 2, 1, 3)
    k = lin(x, p["wk"], p["bk"]).reshape(B, S, NUM_KV_HEADS, HEAD_DIM).transpose(0, 2, 1, 3)
    v = lin(x, p["wv"], p["bv"]).reshape(B, S, NUM_KV_HEADS, HEAD_DIM).transpose(0, 2, 1, 3)
    k = jnp.repeat(k, GROUP, axis=1)
    v = jnp.repeat(v, GROUP, axis=1)
    s = jnp.einsum("bhqd,bhkd->bhqk", q, k) / math.sqrt(HEAD_DIM)
    mask = jnp.tril(jnp.ones((S, S), bool))
    s = jnp.where(mask[None, None], s, NEG_INF)
    w = jax.nn.softmax(s, axis=-1)
    attn = jnp.einsum("bhqk,bhkd->bhqd", w, v).transpose(0, 2, 1, 3).reshape(B, S, E)
    attn = lin(attn, p["wo"], p["bo"])

    h1 = x + attn
    rms1 = jnp.linalg.norm(h1, axis=-1, keepdims=True) / math.sqrt(E)
    h1 = p["g1"] * (h1 / (rms1 + EPS))

    u = lin(h1, p["w1"], p["b1"])
    a, g = u[..., :FFN], u[..., FFN:]
    ff = lin(jax.nn.silu(a) * g, p["w2"], p["b2"])

    h2 = h1 + ff
    rms2 = jnp.linalg.norm(h2, axis=-1, keepdims=True) / math.sqrt(E)
    return p["g2"] * (h2 / (rms2 + EPS))


if __name__ == "__main__":
    key = jax.random.PRNGKey(0)
    kx, kp = jax.random.split(key)
    x = jax.random.normal(kx, (B, S, E), jnp.float32)
    params = init_params(kp)

    out = decoder_forward(x, params)
    out = jax.block_until_ready(out)

    ref = decoder_reference(x, params)
    assert out.shape == (B, S, E)
    assert bool(jnp.all(jnp.isfinite(out)))
    assert bool(jnp.allclose(out, ref, atol=2e-2, rtol=2e-2)), "mismatch vs reference"
    print("KERNEL_OK")
</pallas_src>

<mosaic_0001>
module attributes {stable_mosaic.version = 11 : i64} {
  func.func @decoder_kernel(%arg0: memref<16x32xf32, #tpu.memory_space<vmem>>, %arg1: memref<32x64xf32, #tpu.memory_space<vmem>>, %arg2: memref<32x32xf32, #tpu.memory_space<vmem>>, %arg3: memref<32x256xf32, #tpu.memory_space<vmem>>, %arg4: memref<128x32xf32, #tpu.memory_space<vmem>>, %arg5: memref<1x8x8xf32, #tpu.memory_space<vmem>>, %arg6: memref<1x64xf32, #tpu.memory_space<vmem>>, %arg7: memref<1x32xf32, #tpu.memory_space<vmem>>, %arg8: memref<1x256xf32, #tpu.memory_space<vmem>>, %arg9: memref<1x32xf32, #tpu.memory_space<vmem>>, %arg10: memref<1x32xf32, #tpu.memory_space<vmem>>, %arg11: memref<1x32xf32, #tpu.memory_space<vmem>>, %arg12: memref<16x32xf32, #tpu.memory_space<vmem>>) attributes {dimension_semantics = [], scalar_prefetch = 0 : i64, scratch_operands = 0 : i64, tpu.core_type = #tpu.core_type<tc>} {
    %c0 = arith.constant 0 : index
    %c0_0 = arith.constant 0 : index
    %0 = vector.load %arg0[%c0, %c0_0] : memref<16x32xf32, #tpu.memory_space<vmem>>, vector<16x32xf32>
    %c0_1 = arith.constant 0 : index
    %c0_2 = arith.constant 0 : index
    %1 = vector.load %arg1[%c0_1, %c0_2] : memref<32x64xf32, #tpu.memory_space<vmem>>, vector<32x64xf32>
    %cst = arith.constant dense<0.000000e+00> : vector<16x64xf32>
    %2 = tpu.matmul %0, %1, %cst {dimension_numbers = #tpu.dot_dimension_numbers<[1], [0], [0], [1], [0, 0, 1, 1], [], []>} : vector<16x32xf32>, vector<32x64xf32>, vector<16x64xf32> -> vector<16x64xf32>
    %c0_3 = arith.constant 0 : index
    %c0_4 = arith.constant 0 : index
    %3 = vector.load %arg6[%c0_3, %c0_4] : memref<1x64xf32, #tpu.memory_space<vmem>>, vector<1x64xf32>
    %4 = vector.broadcast %3 : vector<1x64xf32> to vector<16x64xf32>
    %5 = arith.addf %2, %4 : vector<16x64xf32>
    %6 = vector.shape_cast %5 : vector<16x64xf32> to vector<2x8x64xf32>
    %7 = vector.extract_strided_slice %6 {offsets = [0, 0, 0], sizes = [2, 8, 8], strides = [1, 1, 1]} : vector<2x8x64xf32> to vector<2x8x8xf32>
    %8 = vector.extract_strided_slice %6 {offsets = [0, 0, 8], sizes = [2, 8, 8], strides = [1, 1, 1]} : vector<2x8x64xf32> to vector<2x8x8xf32>
    %9 = vector.extract_strided_slice %6 {offsets = [0, 0, 16], sizes = [2, 8, 8], strides = [1, 1, 1]} : vector<2x8x64xf32> to vector<2x8x8xf32>
    %10 = vector.extract_strided_slice %6 {offsets = [0, 0, 24], sizes = [2, 8, 8], strides = [1, 1, 1]} : vector<2x8x64xf32> to vector<2x8x8xf32>
    %11 = tpu.concatenate %7, %8, %9, %10 in 0 : vector<2x8x8xf32>, vector<2x8x8xf32>, vector<2x8x8xf32>, vector<2x8x8xf32> -> vector<8x8x8xf32>
    %12 = vector.extract_strided_slice %6 {offsets = [0, 0, 32], sizes = [2, 8, 8], strides = [1, 1, 1]} : vector<2x8x64xf32> to vector<2x8x8xf32>
    %13 = vector.extract_strided_slice %6 {offsets = [0, 0, 32], sizes = [2, 8, 8], strides = [1, 1, 1]} : vector<2x8x64xf32> to vector<2x8x8xf32>
    %14 = vector.extract_strided_slice %6 {offsets = [0, 0, 40], sizes = [2, 8, 8], strides = [1, 1, 1]} : vector<2x8x64xf32> to vector<2x8x8xf32>
    %15 = vector.extract_strided_slice %6 {offsets = [0, 0, 40], sizes = [2, 8, 8], strides = [1, 1, 1]} : vector<2x8x64xf32> to vector<2x8x8xf32>
    %16 = tpu.concatenate %12, %13, %14, %15 in 0 : vector<2x8x8xf32>, vector<2x8x8xf32>, vector<2x8x8xf32>, vector<2x8x8xf32> -> vector<8x8x8xf32>
    %17 = vector.extract_strided_slice %6 {offsets = [0, 0, 48], sizes = [2, 8, 8], strides = [1, 1, 1]} : vector<2x8x64xf32> to vector<2x8x8xf32>
    %18 = vector.extract_strided_slice %6 {offsets = [0, 0, 48], sizes = [2, 8, 8], strides = [1, 1, 1]} : vector<2x8x64xf32> to vector<2x8x8xf32>
    %19 = vector.extract_strided_slice %6 {offsets = [0, 0, 56], sizes = [2, 8, 8], strides = [1, 1, 1]} : vector<2x8x64xf32> to vector<2x8x8xf32>
    %20 = vector.extract_strided_slice %6 {offsets = [0, 0, 56], sizes = [2, 8, 8], strides = [1, 1, 1]} : vector<2x8x64xf32> to vector<2x8x8xf32>
    %21 = tpu.concatenate %17, %18, %19, %20 in 0 : vector<2x8x8xf32>, vector<2x8x8xf32>, vector<2x8x8xf32>, vector<2x8x8xf32> -> vector<8x8x8xf32>
    "tpu.trace_start"() <{level = 10 : i32, message = "bqd,bkd->bqk"}> : () -> ()
    %cst_5 = arith.constant dense<0.000000e+00> : vector<8x8x8xf32>
    %22 = tpu.matmul %11, %16, %cst_5 {dimension_numbers = #tpu.dot_dimension_numbers<[2], [2], [1], [1], [0, 0, 0, 1, 1, 1], [0], [0]>} : vector<8x8x8xf32>, vector<8x8x8xf32>, vector<8x8x8xf32> -> vector<8x8x8xf32>
    "tpu.trace_stop"() : () -> ()
    %c0_6 = arith.constant 0 : index
    %c0_7 = arith.constant 0 : index
    %c0_8 = arith.constant 0 : index
    %23 = vector.load %arg5[%c0_6, %c0_7, %c0_8] : memref<1x8x8xf32, #tpu.memory_space<vmem>>, vector<1x8x8xf32>
    %24 = vector.broadcast %23 : vector<1x8x8xf32> to vector<8x8x8xf32>
    %25 = arith.addf %22, %24 : vector<8x8x8xf32>
    %cst_9 = arith.constant dense<0xFF800000> : vector<8x8xf32>
    %26 = vector.multi_reduction <maximumf>, %25, %cst_9 [2] : vector<8x8x8xf32> to vector<8x8xf32>
    %27 = vector.shape_cast %26 : vector<8x8xf32> to vector<8x8x1xf32>
    %28 = vector.broadcast %27 : vector<8x8x1xf32> to vector<8x8x8xf32>
    %29 = arith.subf %25, %28 : vector<8x8x8xf32>
    %30 = math.exp %29 : vector<8x8x8xf32>
    %cst_10 = arith.constant dense<0.000000e+00> : vector<8x8xf32>
    %31 = vector.multi_reduction <add>, %30, %cst_10 [2] : vector<8x8x8xf32> to vector<8x8xf32>
    %32 = vector.shape_cast %31 : vector<8x8xf32> to vector<8x8x1xf32>
    %33 = tpu.reciprocal %32 {approx = true} : vector<8x8x1xf32> -> vector<8x8x1xf32>
    %34 = vector.broadcast %33 : vector<8x8x1xf32> to vector<8x8x8xf32>
    %35 = arith.mulf %30, %34 : vector<8x8x8xf32>
    "tpu.trace_start"() <{level = 10 : i32, message = "bqk,bkd->bqd"}> : () -> ()
    %cst_11 = arith.constant dense<0.000000e+00> : vector<8x8x8xf32>
    %36 = tpu.matmul %35, %21, %cst_11 {dimension_numbers = #tpu.dot_dimension_numbers<[2], [1], [1], [2], [0, 0, 0, 1, 1, 2], [0], [0]>} : vector<8x8x8xf32>, vector<8x8x8xf32>, vector<8x8x8xf32> -> vector<8x8x8xf32>
    "tpu.trace_stop"() : () -> ()
    %37 = vector.extract_strided_slice %36 {offsets = [0, 0, 0], sizes = [2, 8, 8], strides = [1, 1, 1]} : vector<8x8x8xf32> to vector<2x8x8xf32>
    %38 = vector.shape_cast %37 : vector<2x8x8xf32> to vector<16x8xf32>
    %39 = vector.extract_strided_slice %36 {offsets = [2, 0, 0], sizes = [2, 8, 8], strides = [1, 1, 1]} : vector<8x8x8xf32> to vector<2x8x8xf32>
    %40 = vector.shape_cast %39 : vector<2x8x8xf32> to vector<16x8xf32>
    %41 = vector.extract_strided_slice %36 {offsets = [4, 0, 0], sizes = [2, 8, 8], strides = [1, 1, 1]} : vector<8x8x8xf32> to vector<2x8x8xf32>
    %42 = vector.shape_cast %41 : vector<2x8x8xf32> to vector<16x8xf32>
    %43 = vector.extract_strided_slice %36 {offsets = [6, 0, 0], sizes = [2, 8, 8], strides = [1, 1, 1]} : vector<8x8x8xf32> to vector<2x8x8xf32>
    %44 = vector.shape_cast %43 : vector<2x8x8xf32> to vector<16x8xf32>
    %45 = tpu.concatenate %38, %40, %42, %44 in 1 : vector<16x8xf32>, vector<16x8xf32>, vector<16x8xf32>, vector<16x8xf32> -> vector<16x32xf32>
    %c0_12 = arith.constant 0 : index
    %c0_13 = arith.constant 0 : index
    %46 = vector.load %arg2[%c0_12, %c0_13] : memref<32x32xf32, #tpu.memory_space<vmem>>, vector<32x32xf32>
    %cst_14 = arith.constant dense<0.000000e+00> : vector<16x32xf32>
    %47 = tpu.matmul %45, %46, %cst_14 {dimension_numbers = #tpu.dot_dimension_numbers<[1], [0], [0], [1], [0, 0, 1, 1], [], []>} : vector<16x32xf32>, vector<32x32xf32>, vector<16x32xf32> -> vector<16x32xf32>
    %c0_15 = arith.constant 0 : index
    %c0_16 = arith.constant 0 : index
    %48 = vector.load %arg7[%c0_15, %c0_16] : memref<1x32xf32, #tpu.memory_space<vmem>>, vector<1x32xf32>
    %49 = vector.broadcast %48 : vector<1x32xf32> to vector<16x32xf32>
    %50 = arith.addf %47, %49 : vector<16x32xf32>
    %51 = arith.addf %0, %50 : vector<16x32xf32>
    %c0_17 = arith.constant 0 : index
    %c0_18 = arith.constant 0 : index
    %52 = vector.load %arg10[%c0_17, %c0_18] : memref<1x32xf32, #tpu.memory_space<vmem>>, vector<1x32xf32>
    %53 = arith.mulf %51, %51 : vector<16x32xf32>
    %cst_19 = arith.constant dense<0.000000e+00> : vector<16xf32>
    %54 = vector.multi_reduction <add>, %53, %cst_19 [1] : vector<16x32xf32> to vector<16xf32>
    %55 = vector.shape_cast %54 : vector<16xf32> to vector<16x1xf32>
    %cst_20 = arith.constant 3.125000e-02 : f32
    %56 = vector.broadcast %cst_20 : f32 to vector<16x1xf32>
    %57 = arith.mulf %55, %56 : vector<16x1xf32>
    %cst_21 = arith.constant 9.99999993E-9 : f32
    %58 = vector.broadcast %cst_21 : f32 to vector<16x1xf32>
    %59 = arith.addf %57, %58 : vector<16x1xf32>
    %60 = math.rsqrt %59 : vector<16x1xf32>
    %61 = vector.broadcast %60 : vector<16x1xf32> to vector<16x32xf32>
    %62 = arith.mulf %51, %61 : vector<16x32xf32>
    %63 = vector.broadcast %52 : vector<1x32xf32> to vector<16x32xf32>
    %64 = arith.mulf %63, %62 : vector<16x32xf32>
    %c0_22 = arith.constant 0 : index
    %c0_23 = arith.constant 0 : index
    %65 = vector.load %arg3[%c0_22, %c0_23] : memref<32x256xf32, #tpu.memory_space<vmem>>, vector<32x256xf32>
    %cst_24 = arith.constant dense<0.000000e+00> : vector<16x256xf32>
    %66 = tpu.matmul %64, %65, %cst_24 {dimension_numbers = #tpu.dot_dimension_numbers<[1], [0], [0], [1], [0, 0, 1, 1], [], []>} : vector<16x32xf32>, vector<32x256xf32>, vector<16x256xf32> -> vector<16x256xf32>
    %c0_25 = arith.constant 0 : index
    %c0_26 = arith.constant 0 : index
    %67 = vector.load %arg8[%c0_25, %c0_26] : memref<1x256xf32, #tpu.memory_space<vmem>>, vector<1x256xf32>
    %68 = vector.broadcast %67 : vector<1x256xf32> to vector<16x256xf32>
    %69 = arith.addf %66, %68 : vector<16x256xf32>
    %70 = vector.extract_strided_slice %69 {offsets = [0, 0], sizes = [16, 128], strides = [1, 1]} : vector<16x256xf32> to vector<16x128xf32>
    %71 = vector.extract_strided_slice %69 {offsets = [0, 128], sizes = [16, 128], strides = [1, 1]} : vector<16x256xf32> to vector<16x128xf32>
    %cst_27 = arith.constant 0.000000e+00 : f32
    %72 = vector.broadcast %cst_27 : f32 to vector<16x128xf32>
    %73 = arith.subf %72, %70 : vector<16x128xf32>
    %74 = math.exp %73 : vector<16x128xf32>
    %cst_28 = arith.constant 1.000000e+00 : f32
    %75 = vector.broadcast %cst_28 : f32 to vector<16x128xf32>
    %76 = arith.addf %75, %74 : vector<16x128xf32>
    %77 = tpu.reciprocal %76 {approx = true} : vector<16x128xf32> -> vector<16x128xf32>
    %78 = arith.mulf %70, %77 : vector<16x128xf32>
    %79 = arith.mulf %78, %71 : vector<16x128xf32>
    %c0_29 = arith.constant 0 : index
    %c0_30 = arith.constant 0 : index
    %80 = vector.load %arg4[%c0_29, %c0_30] : memref<128x32xf32, #tpu.memory_space<vmem>>, vector<128x32xf32>
    %cst_31 = arith.constant dense<0.000000e+00> : vector<16x32xf32>
    %81 = tpu.matmul %79, %80, %cst_31 {dimension_numbers = #tpu.dot_dimension_numbers<[1], [0], [0], [1], [0, 0, 1, 1], [], []>} : vector<16x128xf32>, vector<128x32xf32>, vector<16x32xf32> -> vector<16x32xf32>
    %c0_32 = arith.constant 0 : index
    %c0_33 = arith.constant 0 : index
    %82 = vector.load %arg9[%c0_32, %c0_33] : memref<1x32xf32, #tpu.memory_space<vmem>>, vector<1x32xf32>
    %83 = vector.broadcast %82 : vector<1x32xf32> to vector<16x32xf32>
    %84 = arith.addf %81, %83 : vector<16x32xf32>
    %85 = arith.addf %64, %84 : vector<16x32xf32>
    %c0_34 = arith.constant 0 : index
    %c0_35 = arith.constant 0 : index
    %86 = vector.load %arg11[%c0_34, %c0_35] : memref<1x32xf32, #tpu.memory_space<vmem>>, vector<1x32xf32>
    %87 = arith.mulf %85, %85 : vector<16x32xf32>
    %cst_36 = arith.constant dense<0.000000e+00> : vector<16xf32>
    %88 = vector.multi_reduction <add>, %87, %cst_36 [1] : vector<16x32xf32> to vector<16xf32>
    %89 = vector.shape_cast %88 : vector<16xf32> to vector<16x1xf32>
    %cst_37 = arith.constant 3.125000e-02 : f32
    %90 = vector.broadcast %cst_37 : f32 to vector<16x1xf32>
    %91 = arith.mulf %89, %90 : vector<16x1xf32>
    %cst_38 = arith.constant 9.99999993E-9 : f32
    %92 = vector.broadcast %cst_38 : f32 to vector<16x1xf32>
    %93 = arith.addf %91, %92 : vector<16x1xf32>
    %94 = math.rsqrt %93 : vector<16x1xf32>
    %95 = vector.broadcast %94 : vector<16x1xf32> to vector<16x32xf32>
    %96 = arith.mulf %85, %95 : vector<16x32xf32>
    %97 = vector.broadcast %86 : vector<1x32xf32> to vector<16x32xf32>
    %98 = arith.mulf %97, %96 : vector<16x32xf32>
    %c0_39 = arith.constant 0 : index
    %c0_40 = arith.constant 0 : index
    %99 = vector.load %arg12[%c0_39, %c0_40] : memref<16x32xf32, #tpu.memory_space<vmem>>, vector<16x32xf32>
    tpu.vector_store %arg12[%c0_39, %c0_40], %98 {strides = array<i32>} : memref<16x32xf32, #tpu.memory_space<vmem>>, vector<16x32xf32>,
    return
  }
}

</mosaic_0001>

<bundles_post_ra>
// kernel: tpu_custom_call.1
= control target key start
LH: loop header
LB: loop body
LE: loop exit
PB: predicated region body
PF: predicated region fallthrough
CT: control target
= control target key end

     0   :  { %vm55_vm0 = vcmask 261120   ;;  %s2599_s0 = inlined_call_operand.vmem [shape: f32[16,32], index: 0, kind: input, shape index: {}]   ;;  %s2600_s1 = inlined_call_operand.vmem [shape: f32[32,64], index: 1, kind: input, shape index: {}]   ;;  %s2601_s2 = inlined_call_operand.vmem [shape: f32[32,32], index: 2, kind: input, shape index: {}]   ;;  %s2602_s3 = inlined_call_operand.vmem [shape: f32[32,256], index: 3, kind: input, shape index: {}]   ;;  %s2603_s4 = inlined_call_operand.vmem [shape: f32[128,32], index: 4, kind: input, shape index: {}]   ;;  %s2604_s5 = inlined_call_operand.vmem [shape: f32[1,8,8], index: 5, kind: input, shape index: {}]   ;;  %s2605_s6 = inlined_call_operand.vmem [shape: f32[1,64], index: 6, kind: input, shape index: {}]   ;;  %s2606_s7 = inlined_call_operand.vmem [shape: f32[1,32], index: 7, kind: input, shape index: {}]   ;;  %s2607_s8 = inlined_call_operand.vmem [shape: f32[1,256], index: 8, kind: input, shape index: {}]   ;;  %s2608_s9 = inlined_call_operand.vmem [shape: f32[1,32], index: 9, kind: input, shape index: {}]   ;;  %s2609_s10 = inlined_call_operand.vmem [shape: f32[1,32], index: 10, kind: input, shape index: {}]   ;;  %s2610_s11 = inlined_call_operand.vmem [shape: f32[1,32], index: 11, kind: input, shape index: {}]   ;;  %s2611_s12 = inlined_call_operand.hbm [shape: f32[16,32], index: 12, kind: output, shape index: {}]  }
   0x1   :  { %v44_v0 = vld [vmem:[%s2600_s1] sm:$0xff]  ;;  %v45_v1 = vld [vmem:[%s2600_s1 + $0x8] sm:$0xff]  ;;  %v46_v2 = vld [vmem:[%s2600_s1 + $0x10] sm:$0xff] }
   0x2   :  { %v2074_v3 = vpack.c.bf16 %v45_v1, %v44_v0  ;;  %v47_v4 = vld [vmem:[%s2600_s1 + $0x18] sm:$0xff]  ;;  %v2306_v5 = vld [vmem:[%s2599_s0] sm:$0xff] }
   0x3   :  { %v2078_v6 = vpack.c.bf16 %v47_v4, %v46_v2  ;;  %1945 = vmatprep.mubr.msk.f32.mxu1 %vm55_vm0, %v2306_v5 }
   0x4   :  { %17 = vsyncpa [#allocation3], 0  ;;  %2075 = vmatprep.subr.bf16.mxu1 %v2074_v3  ;;  %v2313_v7 = vld [vmem:[%s2599_s0 + $0x8] sm:$0xff]  ;;  %v2214_v8 = vmov 0.0   ;;  %vm2215_vm1 = vmmov 0   ;;  %s2216_s0 = smov 96  }
   0x5   :  { %2077 = vmatpush3.bf16.msra.mxu1 %v2074_v3  ;;  %1968 = vmatprep.subr.mxu0 %v2214_v8  ;;  %v1840_v9 = vld [vmem:[%s2605_s6] ss:$0 sm:$0xff]  ;;  %s2217_s16 = smov 120   ;;  %vm154_vm2 = vcmask 64512   ;;  %s2218_s6 = smov 112   ;;  %vm1455_vm3 = vcmask 130048  }
   0x6   :  { %2079 = vmatprep.subr.bf16.mxu1 %v2078_v6  ;;  %1970 = vmatprep.mubr.msk.f32.mxu0 %vm2215_vm1, %v2214_v8  ;;  %s2219_s17 = smov 104   ;;  %v151_v24 = vld [vmem:[%s2604_s5] sm:$0xff]  ;;  %s2220_s5 = smov 80   ;;  %vm1458_vm4 = vcmask 195584  }
   0x7   :  { %s2221_s20 = smov 8   ;;  %s2222_s21 = smov 16  }
   0x8   :  { %s2223_s30 = smov 24   ;;  %s2224_s15 = smov [#allocation2]  }
   0x9   :  { %2081 = vmatpush3.bf16.msra.mxu1 %v2078_v6 }
   0xa   :  { %1948 = vmatprep.subr.mxu1 %v2214_v8 }
   0xc   :  { %1946 = vmatmul.mubr.msk.f32.vlgmr.msra.gmra.mrb[0].mxu1 %vm55_vm0, %v2313_v7 }
   0xd   :  { %1950 = vmatprep.mubr.msk.f32.mxu1 %vm2215_vm1, %v2214_v8 }
  0xdf   :  { %v1947_v10 = vpop.f32.mrb[0].mxu1 }
  0xe0   :  { %v128_v11 = vpop.f32.mrb[1].mxu1  ;;  %v2330_v13 = vadd.f32 %v1947_v10, %v1840_v9 }
  0xe1   :  { %v2326_v12 = vadd.f32 %v1840_v9, %v128_v11 }
  0xe3   :  { %152 = vrot.lane.b32.xlu1 %v2326_v12, %s2216_s0  ;;  %139 = vrot.lane.b32.xlu0 %v2326_v12, %s2217_s16 }
  0xe7   :  { %229 = vrot.lane.b32.xlu1 %v2330_v13, %s2216_s0  ;;  %141 = vrot.lane.b32.xlu0 %v2330_v13, %s2217_s16 }
 0x155   :  { %v153_v14 = vpop.permute.xlu1 %152  ;;  %v2334_v15 = vpop.permute.xlu0 %139 }
 0x156   :  { %1949 = vmatpush3.xpose.msk.msra.mxu1 %vm154_vm2, %v153_v14  ;;  %449 = vrot.lane.b32.xlu0 %v2334_v15, %s2216_s0 }
 0x157   :  { %1953 = vmatprep.subr.mxu1 %v2214_v8 }
 0x159   :  { %1951 = vmatmul.mubr.msk.f32.vlgmr.msra.gmra.mrb[2].mxu1 %vm154_vm2, %v2326_v12  ;;  %v230_v16 = vpop.permute.xlu1 %229  ;;  %v2341_v17 = vpop.permute.xlu0 %141 }
 0x15a   :  { %1954 = vmatpush3.xpose.msk.msra.mxu1 %vm154_vm2, %v230_v16  ;;  %143 = vrot.lane.b32.xlu0 %v2326_v12, %s2218_s6 }
 0x15b   :  { %525 = vrot.lane.b32.xlu1 %v2341_v17, %s2216_s0  ;;  %1955 = vmatprep.mubr.msk.f32.mxu1 %vm2215_vm1, %v2214_v8  ;;  %s1829_s0 = sshll.u32 %s2224_s15, 4  ;;  %s1830_s0 = int_to_ptr.vmem [resolvable:$true] %s1829_s0 }
 0x15c   :  { %1958 = vmatprep.subr.mxu1 %v2214_v8  ;;  %s2190_s16 = scalar_lea.vmem %s1830_s0, 256  ;;  %p2195_p1 = scmp.lt.s32.totalorder %s1830_s0, %s1830_s0 }
 0x15d   :  { %1956 = vmatmul.mubr.msk.f32.vlgmr.msra.gmra.mrb[4].mxu1 %vm154_vm2, %v2330_v13  ;;  %p2191_p0 = scmp.ne.s32.totalorder %s1830_s0, %s2190_s16  ;;  %p2196_p2 = scmp.lt.s32.totalorder %s2190_s16, %s2190_s16 }
 0x15e   :  { %1959 = vmatpush3.xpose.msk.msra.mxu1 %vm154_vm2, %v153_v14  ;;  %147 = vrot.lane.b32.xlu0 %v2326_v12, %s2219_s17 }
 0x15f   :  { %145 = vrot.lane.b32.xlu1 %v2330_v13, %s2218_s6  ;;  %1960 = vmatprep.mubr.msk.f32.mxu1 %vm2215_vm1, %v2214_v8  ;;  %p2197_p3 = por %p2196_p2, %p2195_p1 }
 0x160   :  { %1963 = vmatprep.subr.mxu1 %v2214_v8 }
 0x161   :  { %1961 = vmatmul.mubr.msk.f32.vlgmr.msra.gmra.mrb[6].mxu1 %vm154_vm2, %v2334_v15  ;;  %p2198_p4 = pnand %p2197_p3, %p2191_p0 }
 0x162   :  { %1964 = vmatpush3.xpose.msk.msra.mxu1 %vm154_vm2, %v230_v16  ;;  %1965 = vmatprep.mubr.msk.f32.mxu1 %vm2215_vm1, %v2214_v8 }
 0x163   :  { %149 = vrot.lane.b32.xlu1 %v2330_v13, %s2219_s17  ;;  %1973 = vmatprep.subr.mxu1 %v2214_v8 }
 0x165   :  { %1966 = vmatmul.mubr.msk.f32.vlgmr.msra.gmra.mrb[8].mxu1 %vm154_vm2, %v2341_v17 }
 0x166   :  { %1975 = vmatprep.mubr.msk.f32.mxu1 %vm2215_vm1, %v2214_v8 }
 0x1c8   :  { %v450_v18 = vpop.permute.xlu0 %449 }
 0x1c9   :  { %1969 = vmatpush3.xpose.msk.msra.mxu0 %vm154_vm2, %v450_v18 }
 0x1ca   :  { %1978 = vmatprep.subr.mxu0 %v2214_v8 }
 0x1cc   :  { %v144_v19 = vpop.permute.xlu0 %143 }
 0x1cd   :  { %v526_v20 = vpop.permute.xlu1 %525  ;;  %1971 = vmatmul.mubr.msk.f32.vlgmr.msra.gmra.mrb[0].mxu0 %vm154_vm2, %v144_v19 }
 0x1ce   :  { %1974 = vmatpush3.xpose.msk.msra.mxu1 %vm154_vm2, %v526_v20  ;;  %1979 = vmatpush3.xpose.msk.msra.mxu0 %vm154_vm2, %v450_v18 }
 0x1cf   :  { %1980 = vmatprep.mubr.msk.f32.mxu0 %vm2215_vm1, %v2214_v8  ;;  %1983 = vmatprep.subr.mxu1 %v2214_v8 }
 0x1d0   :  { %v148_v21 = vpop.permute.xlu0 %147  ;;  %1988 = vmatprep.subr.mxu0 %v2214_v8 }
 0x1d1   :  { %v146_v22 = vpop.permute.xlu1 %145  ;;  %1981 = vmatmul.mubr.msk.f32.vlgmr.msra.gmra.mrb[2].mxu0 %vm154_vm2, %v148_v21 }
 0x1d2   :  { %1976 = vmatmul.mubr.msk.f32.vlgmr.msra.gmra.mrb[10].mxu1 %vm154_vm2, %v146_v22  ;;  %1990 = vmatprep.mubr.msk.f32.mxu0 %vm2215_vm1, %v2214_v8 }
 0x1d3   :  { %1984 = vmatpush3.xpose.msk.msra.mxu1 %vm154_vm2, %v526_v20  ;;  %1985 = vmatprep.mubr.msk.f32.mxu1 %vm2215_vm1, %v2214_v8 }
 0x1d4   :  { %1993 = vmatprep.subr.mxu1 %v2214_v8 }
 0x1d5   :  { %v150_v23 = vpop.permute.xlu1 %149 }
 0x1d6   :  { %1986 = vmatmul.mubr.msk.f32.vlgmr.msra.gmra.mrb[12].mxu1 %vm154_vm2, %v150_v23 }
 0x1d7   :  { %1995 = vmatprep.mubr.msk.f32.mxu1 %vm2215_vm1, %v2214_v8 }
 0x22c   :  { %v225_v25 = vpop.f32.mrb[2].mxu1 }
 0x22d   :  { %v226_v26 = vadd.f32 %v225_v25, %v151_v24  ;;  %v1952_v27 = vpop.f32.mrb[3].mxu1 }
 0x22f   :  { %v745_v28 = vsel %vm154_vm2, %v226_v26, -inf }
 0x230   :  { %v301_v29 = vpop.f32.mrb[4].mxu1  ;;  %746 = vmax.xlane.f32.xlu0 %v745_v28 }
 0x231   :  { %v302_v30 = vadd.f32 %v301_v29, %v151_v24  ;;  %v1957_v31 = vpop.f32.mrb[5].mxu1 }
 0x233   :  { %v748_v32 = vsel %vm154_vm2, %v302_v30, -inf }
 0x234   :  { %v373_v33 = vpop.f32.mrb[6].mxu1  ;;  %749 = vmax.xlane.f32.xlu1 %v748_v32 }
 0x235   :  { %v374_v34 = vadd.f32 %v373_v33, %v151_v24  ;;  %v1962_v35 = vpop.f32.mrb[7].mxu1 }
 0x237   :  { %v751_v36 = vsel %vm154_vm2, %v374_v34, -inf }
 0x238   :  { %752 = vmax.xlane.f32.xlu0 %v751_v36  ;;  %v445_v37 = vpop.f32.mrb[8].mxu1 }
 0x239   :  { %v446_v38 = vadd.f32 %v445_v37, %v151_v24  ;;  %v1967_v39 = vpop.f32.mrb[9].mxu1 }
 0x23b   :  { %v754_v40 = vsel %vm154_vm2, %v446_v38, -inf }
 0x23c   :  { %755 = vmax.xlane.f32.xlu0 %v754_v40 }
 0x2a0   :  { %v521_v41 = vpop.f32.mrb[0].mxu0 }
 0x2a1   :  { %v522_v42 = vadd.f32 %v521_v41, %v151_v24  ;;  %v1972_v43 = vpop.f32.mrb[1].mxu0 }
 0x2a3   :  { %v757_v44 = vsel %vm154_vm2, %v522_v42, -inf }
 0x2a4   :  { %v669_v45 = vpop.f32.mrb[2].mxu0  ;;  %758 = vmax.xlane.f32.xlu1 %v757_v44 }
 0x2a5   :  { %v2396_v46 = vadd.f32 %v669_v45, %v151_v24  ;;  %v597_v47 = vpop.f32.mrb[10].mxu1  ;;  %v1982_v48 = vpop.f32.mrb[3].mxu0 }
 0x2a6   :  { %v598_v49 = vadd.f32 %v597_v47, %v151_v24  ;;  %v1977_v50 = vpop.f32.mrb[11].mxu1 }
 0x2a7   :  { %v763_v51 = vsel %vm154_vm2, %v2396_v46, -inf }
 0x2a8   :  { %764 = vmax.xlane.f32.xlu1 %v763_v51  ;;  %v760_v52 = vsel %vm154_vm2, %v598_v49, -inf }
 0x2a9   :  { %761 = vmax.xlane.f32.xlu0 %v760_v52  ;;  %v741_v53 = vpop.f32.mrb[12].mxu1 }
 0x2aa   :  { %v742_v54 = vadd.f32 %v741_v53, %v151_v24  ;;  %v1987_v55 = vpop.f32.mrb[13].mxu1 }
 0x2ac   :  { %v766_v56 = vsel %vm154_vm2, %v742_v54, -inf }
 0x2ad   :  { %767 = vmax.xlane.f32.xlu0 %v766_v56 }
 0x2b9   :  { %833 = vrot.lane.b32.xlu1 %v2326_v12, %s2220_s5 }
 0x2bd   :  { %v747_v57 = vpop.xlane.xlu0 %746 }
 0x2be   :  { %v769_v62 = vsub.f32 %v226_v26, %v747_v57 }
 0x2c0   :  { %v777_v1 = vmul.f32 1.442695, %v769_v62 }
 0x2c1   :  { %v750_v58 = vpop.xlane.xlu1 %749 }
 0x2c2   :  { %v770_v59 = vsub.f32 %v302_v30, %v750_v58 }
 0x2c4   :  { %v779_v60 = vmul.f32 1.442695, %v770_v59 }
 0x2c5   :  { %v753_v61 = vpop.xlane.xlu0 %752 }
 0x2c6   :  { %2142 = vpow2.f32 %v779_v60  ;;  %v771_v2 = vsub.f32 %v374_v34, %v753_v61 }
 0x2c8   :  { %v781_v4 = vmul.f32 1.442695, %v771_v2 }
 0x2c9   :  { %v756_v63 = vpop.xlane.xlu0 %755 }
 0x2ca   :  { %v772_v0 = vsub.f32 %v446_v38, %v756_v63 }
 0x2cc   :  { %v783_v3 = vmul.f32 1.442695, %v772_v0 }
 0x2ce   :  { %2144 = vpow2.f32 %v783_v3 }
 0x2cf   :  { %2146 = vpow2.f32 %v777_v1 }
 0x2d0   :  { %v2404_v6 = vpop.eup %2142  ;;  %2148 = vpow2.f32 %v781_v4 }
 0x2d1   :  { %v796_v9 = vsel %vm154_vm2, %v2404_v6, 0.0 }
 0x2d2   :  { %797 = vadd.xlane.f32.xlu0 %v796_v9 }
 0x2d8   :  { %v2408_v10 = vpop.eup %2144 }
 0x2d9   :  { %v2147_v11 = vpop.eup %2146  ;;  %v802_v12 = vsel %vm154_vm2, %v2408_v10, 0.0 }
 0x2da   :  { %803 = vadd.xlane.f32.xlu0 %v802_v12  ;;  %v793_v14 = vsel %vm154_vm2, %v2147_v11, 0.0  ;;  %v2149_v16 = vpop.eup %2148 }
 0x2db   :  { %v799_v18 = vsel %vm154_vm2, %v2149_v16, 0.0 }
 0x2dd   :  { %794 = vadd.xlane.f32.xlu1 %v793_v14  ;;  %v1461_v14 = vld [vmem:[%s2601_s2] sm:$0xff] }
 0x2e1   :  { %800 = vadd.xlane.f32.xlu1 %v799_v18 }
 0x331   :  { %v759_v19 = vpop.xlane.xlu1 %758 }
 0x332   :  { %v773_v20 = vsub.f32 %v522_v42, %v759_v19  ;;  %v1463_v19 = vld [vmem:[%s2601_s2 + $0x10] sm:$0xff] }
 0x334   :  { %v785_v21 = vmul.f32 1.442695, %v773_v20  ;;  %v1464_v20 = vld [vmem:[%s2601_s2 + $0x18] sm:$0xff] }
 0x335   :  { %v765_v22 = vpop.xlane.xlu1 %764 }
 0x336   :  { %2150 = vpow2.f32 %v785_v21  ;;  %v762_v23 = vpop.xlane.xlu0 %761  ;;  %v775_v36 = vsub.f32 %v2396_v46, %v765_v22  ;;  %v2086_v21 = vpack.c.bf16 %v1464_v20, %v1463_v19  ;;  %v1702_v19 = vld [vmem:[%s2603_s4 + $0x28] sm:$0xff] }
 0x337   :  { %v774_v24 = vsub.f32 %v598_v49, %v762_v23 }
 0x338   :  { %v789_v37 = vmul.f32 1.442695, %v775_v36 }
 0x339   :  { %v787_v25 = vmul.f32 1.442695, %v774_v24  ;;  %v834_v26 = vpop.permute.xlu1 %833 }
 0x33a   :  { %v768_v27 = vpop.xlane.xlu0 %767  ;;  %1989 = vmatpush3.msra.mxu0 %v834_v26 }
 0x33b   :  { %2152 = vpow2.f32 %v787_v25  ;;  %v776_v28 = vsub.f32 %v742_v54, %v768_v27  ;;  %1998 = vmatprep.subr.mxu0 %v2214_v8 }
 0x33d   :  { %v791_v29 = vmul.f32 1.442695, %v776_v28 }
 0x33f   :  { %2154 = vpow2.f32 %v791_v29 }
 0x340   :  { %v2151_v30 = vpop.eup %2150  ;;  %2156 = vpow2.f32 %v789_v37 }
 0x341   :  { %v805_v31 = vsel %vm154_vm2, %v2151_v30, 0.0 }
 0x342   :  { %806 = vadd.xlane.f32.xlu1 %v805_v31 }
 0x345   :  { %v2416_v32 = vpop.eup %2152 }
 0x346   :  { %v808_v33 = vsel %vm154_vm2, %v2416_v32, 0.0 }
 0x347   :  { %809 = vadd.xlane.f32.xlu0 %v808_v33 }
 0x349   :  { %v2420_v34 = vpop.eup %2154 }
 0x34a   :  { %v814_v35 = vsel %vm154_vm2, %v2420_v34, 0.0  ;;  %v2157_v40 = vpop.eup %2156 }
 0x34b   :  { %815 = vadd.xlane.f32.xlu0 %v814_v35  ;;  %v811_v43 = vsel %vm154_vm2, %v2157_v40, 0.0 }
 0x353   :  { %1131 = vrot.lane.b32.xlu1 %v2334_v15, %s2220_s5 }
 0x35f   :  { %v798_v44 = vpop.xlane.xlu0 %797 }
 0x361   :  { %909 = vrot.lane.b32.xlu0 %v2330_v13, %s2220_s5 }
 0x367   :  { %v804_v46 = vpop.xlane.xlu0 %803 }
 0x36a   :  { %v795_v38 = vpop.xlane.xlu1 %794 }
 0x36b   :  { %2158 = vrcp.f32 %v795_v38 }
 0x36e   :  { %v801_v39 = vpop.xlane.xlu1 %800 }
 0x36f   :  { %2160 = vrcp.f32 %v801_v39 }
 0x370   :  { %2162 = vrcp.f32 %v798_v44 }
 0x375   :  { %v2159_v41 = vpop.eup %2158 }
 0x376   :  { %v825_v42 = vmul.f32 %v2159_v41, %v2147_v11 }
 0x377   :  { %812 = vadd.xlane.f32.xlu1 %v811_v43 }
 0x378   :  { %1991 = vmatmul.mubr.msk.f32.vlgmr.msra.gmra.mrb[4].mxu0 %vm154_vm2, %v825_v42 }
 0x379   :  { %v2161_v15 = vpop.eup %2160  ;;  %1999 = vmatpush3.msra.mxu0 %v834_v26  ;;  %2000 = vmatprep.mubr.msk.f32.mxu0 %vm2215_vm1, %v2214_v8 }
 0x37a   :  { %v827_v13 = vmul.f32 %v2161_v15, %v2149_v16  ;;  %2008 = vmatprep.subr.mxu0 %v2214_v8  ;;  %v2163_v50 = vpop.eup %2162  ;;  %v1462_v16 = vld [vmem:[%s2601_s2 + $0x8] sm:$0xff] }
 0x37b   :  { %v826_v53 = vmul.f32 %v2163_v50, %v2404_v6  ;;  %v2082_v18 = vpack.c.bf16 %v1462_v16, %v1461_v14  ;;  %v1583_v50 = vld [vmem:[%s2602_s3 + $0x18] sm:$0xff] }
 0x37c   :  { %2001 = vmatmul.mubr.msk.f32.vlgmr.msra.gmra.mrb[6].mxu0 %vm154_vm2, %v827_v13  ;;  %v1700_v14 = vld [vmem:[%s2603_s4 + $0x18] sm:$0xff] }
 0x37d   :  { %2010 = vmatprep.mubr.msk.f32.mxu0 %vm2215_vm1, %v2214_v8 }
 0x388   :  { %1207 = vrot.lane.b32.xlu1 %v2341_v17, %s2220_s5 }
 0x3cf   :  { %v807_v45 = vpop.xlane.xlu1 %806 }
 0x3d0   :  { %2164 = vrcp.f32 %v807_v45 }
 0x3d1   :  { %2166 = vrcp.f32 %v804_v46 }
 0x3d3   :  { %v1132_v47 = vpop.permute.xlu1 %1131 }
 0x3d4   :  { %v810_v48 = vpop.xlane.xlu0 %809  ;;  %2009 = vmatpush3.msra.mxu0 %v1132_v47 }
 0x3d5   :  { %2018 = vmatprep.subr.mxu0 %v2214_v8  ;;  %2168 = vrcp.f32 %v810_v48 }
 0x3d8   :  { %v816_v49 = vpop.xlane.xlu0 %815 }
 0x3d9   :  { %2170 = vrcp.f32 %v816_v49  ;;  %v1581_v49 = vld [vmem:[%s2602_s3 + $0x8] sm:$0xff] }
 0x3da   :  { %v2165_v51 = vpop.eup %2164 }
 0x3db   :  { %v829_v52 = vmul.f32 %v2165_v51, %v2151_v30  ;;  %v2167_v55 = vpop.eup %2166  ;;  %v2090_v51 = vpack.c.bf16 %v1583_v50, %v1581_v49 }
 0x3dc   :  { %v910_v54 = vpop.permute.xlu0 %909  ;;  %v828_v17 = vmul.f32 %v2167_v55, %v2408_v10 }
 0x3dd   :  { %1994 = vmatpush3.msra.mxu1 %v910_v54  ;;  %2011 = vmatmul.mubr.msk.f32.vlgmr.msra.gmra.mrb[8].mxu0 %vm154_vm2, %v829_v52 }
 0x3de   :  { %1996 = vmatmul.mubr.msk.f32.vlgmr.msra.gmra.mrb[14].mxu1 %vm154_vm2, %v826_v53  ;;  %2003 = vmatprep.subr.mxu1 %v2214_v8  ;;  %v1585_v53 = vld [vmem:[%s2602_s3 + $0x28] sm:$0xff] }
 0x3df   :  { %2019 = vmatpush3.msra.mxu0 %v1132_v47  ;;  %2004 = vmatpush3.msra.mxu1 %v910_v54  ;;  %v2169_v57 = vpop.eup %2168  ;;  %v1587_v54 = vld [vmem:[%s2602_s3 + $0x38] sm:$0xff] }
 0x3e0   :  { %2005 = vmatprep.mubr.msk.f32.mxu1 %vm2215_vm1, %v2214_v8  ;;  %2013 = vmatprep.subr.mxu1 %v2214_v8  ;;  %v830_v58 = vmul.f32 %v2169_v57, %v2416_v32  ;;  %v2094_v55 = vpack.c.bf16 %v1587_v54, %v1585_v53 }
 0x3e1   :  { %2020 = vmatprep.mubr.msk.f32.mxu0 %vm2215_vm1, %v2214_v8  ;;  %2083 = vmatprep.subr.bf16.mxu0 %v2082_v18 }
 0x3e2   :  { %2006 = vmatmul.mubr.msk.f32.vlgmr.msra.gmra.mrb[16].mxu1 %vm154_vm2, %v828_v17  ;;  %v1584_v17 = vld [vmem:[%s2602_s3 + $0x20] sm:$0xff] }
 0x3e3   :  { %2015 = vmatprep.mubr.msk.f32.mxu1 %vm2215_vm1, %v2214_v8  ;;  %v2171_v60 = vpop.eup %2170 }
 0x3e4   :  { %v832_v61 = vmul.f32 %v2171_v60, %v2420_v34 }
 0x404   :  { %v813_v56 = vpop.xlane.xlu1 %812 }
 0x405   :  { %2172 = vrcp.f32 %v813_v56  ;;  %v1586_v56 = vld [vmem:[%s2602_s3 + $0x30] sm:$0xff] }
 0x406   :  { %v2096_v57 = vpack.c.bf16 %v1586_v56, %v1584_v17 }
 0x408   :  { %v1208_v59 = vpop.permute.xlu1 %1207 }
 0x409   :  { %2014 = vmatpush3.msra.mxu1 %v1208_v59 }
 0x40a   :  { %2016 = vmatmul.mubr.msk.f32.vlgmr.msra.gmra.mrb[18].mxu1 %vm154_vm2, %v830_v58  ;;  %2023 = vmatprep.subr.mxu1 %v2214_v8 }
 0x40b   :  { %2024 = vmatpush3.msra.mxu1 %v1208_v59  ;;  %2025 = vmatprep.mubr.msk.f32.mxu1 %vm2215_vm1, %v2214_v8 }
 0x40c   :  { %2091 = vmatprep.subr.bf16.mxu1 %v2090_v51 }
 0x40e   :  { %2026 = vmatmul.mubr.msk.f32.vlgmr.msra.gmra.mrb[20].mxu1 %vm154_vm2, %v832_v61 }
 0x40f   :  { %v2173_v62 = vpop.eup %2172  ;;  %1670 = vmatprep.mubr.f32.mxu1 %v2214_v8 }
 0x410   :  { %v831_v63 = vmul.f32 %v2173_v62, %v2157_v40  ;;  %v1867_v40 = vld [vmem:[%s2606_s7] ss:$0 sm:$0xff] }
 0x412   :  { %2021 = vmatmul.mubr.msk.f32.vlgmr.msra.gmra.mrb[10].mxu0 %vm154_vm2, %v831_v63 }
 0x413   :  { %2085 = vmatpush3.bf16.msra.mxu0 %v2082_v18  ;;  %v1701_v18 = vld [vmem:[%s2603_s4 + $0x20] sm:$0xff] }
 0x414   :  { %2087 = vmatprep.subr.bf16.mxu0 %v2086_v21  ;;  %v2106_v20 = vpack.c.bf16 %v1702_v19, %v1701_v18 }
 0x417   :  { %2089 = vmatpush3.bf16.msra.mxu0 %v2086_v21  ;;  %v1703_v21 = vld [vmem:[%s2603_s4 + $0x30] sm:$0xff] }
 0x44b   :  { %v905_v0 = vpop.f32.mrb[4].mxu0 }
 0x44c   :  { %v1992_v1 = vpop.f32.mrb[5].mxu0 }
 0x44f   :  { %v1054_v2 = vpop.f32.mrb[6].mxu0 }
 0x450   :  { %1431 = vrot.lane.b32.xlu0 %v1054_v2, %s2221_s20  ;;  %v2002_v3 = vpop.f32.mrb[7].mxu0  ;;  %v1870_v2 = vld [vmem:[%s2609_s10] ss:$0 sm:$0xff] }
 0x4b0   :  { %v1203_v4 = vpop.f32.mrb[8].mxu0 }
 0x4b1   :  { %v981_v6 = vpop.f32.mrb[14].mxu1  ;;  %1439 = vrot.lane.b32.xlu0 %v1203_v4, %s2222_s21  ;;  %v2012_v9 = vpop.f32.mrb[9].mxu0 }
 0x4b2   :  { %v1997_v10 = vpop.f32.mrb[15].mxu1 }
 0x4b3   :  { %v1697_v10 = vld [vmem:[%s2603_s4] sm:$0xff] }
 0x4b5   :  { %v1127_v11 = vpop.f32.mrb[16].mxu1 }
 0x4b6   :  { %v2007_v12 = vpop.f32.mrb[17].mxu1  ;;  %1433 = vrot.lane.b32.xlu1 %v1127_v11, %s2221_s20  ;;  %v1698_v11 = vld [vmem:[%s2603_s4 + $0x8] sm:$0xff] }
 0x4b7   :  { %v2098_v12 = vpack.c.bf16 %v1698_v11, %v1697_v10 }
 0x4b9   :  { %2099 = vmatprep.subr.bf16.mxu0 %v2098_v12 }
 0x4c2   :  { %v1432_v29 = vpop.permute.xlu0 %1431 }
 0x4c3   :  { %v1453_v32 = vsel %vm154_vm2, %v905_v0, %v1432_v29 }
 0x4dd   :  { %v1279_v22 = vpop.f32.mrb[18].mxu1 }
 0x4de   :  { %1441 = vrot.lane.b32.xlu1 %v1279_v22, %s2222_s21  ;;  %v2017_v23 = vpop.f32.mrb[19].mxu1  ;;  %v1704_v22 = vld [vmem:[%s2603_s4 + $0x38] sm:$0xff] }
 0x4df   :  { %v2110_v23 = vpack.c.bf16 %v1704_v22, %v1703_v21 }
 0x4e1   :  { %v1425_v24 = vpop.f32.mrb[20].mxu1 }
 0x4e2   :  { %1449 = vrot.lane.b32.xlu1 %v1425_v24, %s2223_s30  ;;  %v2027_v25 = vpop.f32.mrb[21].mxu1  ;;  %v1705_v24 = vld [vmem:[%s2603_s4 + $0x40] sm:$0xff] }
 0x4e3   :  { %v1706_v25 = vld [vmem:[%s2603_s4 + $0x48] sm:$0xff] }
 0x4e5   :  { %v1352_v26 = vpop.f32.mrb[10].mxu0 }
 0x4e6   :  { %1447 = vrot.lane.b32.xlu0 %v1352_v26, %s2223_s30  ;;  %v2022_v27 = vpop.f32.mrb[11].mxu0  ;;  %v2114_v26 = vpack.c.bf16 %v1706_v25, %v1705_v24 }
 0x4e7   :  { %v1707_v27 = vld [vmem:[%s2603_s4 + $0x50] sm:$0xff] }
 0x523   :  { %v1440_v31 = vpop.permute.xlu0 %1439 }
 0x524   :  { %v1456_v34 = vsel %vm1455_vm3, %v1453_v32, %v1440_v31  ;;  %v1710_v31 = vld [vmem:[%s2603_s4 + $0x68] sm:$0xff] }
 0x528   :  { %v1434_v28 = vpop.permute.xlu1 %1433 }
 0x529   :  { %v1454_v35 = vsel %vm154_vm2, %v981_v6, %v1434_v28  ;;  %v1708_v28 = vld [vmem:[%s2603_s4 + $0x58] sm:$0xff] }
 0x52a   :  { %v2118_v29 = vpack.c.bf16 %v1708_v28, %v1707_v27 }
 0x550   :  { %v1442_v30 = vpop.permute.xlu1 %1441 }
 0x551   :  { %v1457_v37 = vsel %vm1455_vm3, %v1454_v35, %v1442_v30  ;;  %v1709_v30 = vld [vmem:[%s2603_s4 + $0x60] sm:$0xff] }
 0x552   :  { %v2122_v32 = vpack.c.bf16 %v1710_v31, %v1709_v30 }
 0x554   :  { %v1450_v33 = vpop.permute.xlu1 %1449 }
 0x555   :  { %v1460_v39 = vsel %vm1458_vm4, %v1457_v37, %v1450_v33  ;;  %v1711_v33 = vld [vmem:[%s2603_s4 + $0x70] sm:$0xff] }
 0x558   :  { %v1448_v36 = vpop.permute.xlu0 %1447 }
 0x559   :  { %v1459_v38 = vsel %vm1458_vm4, %v1456_v34, %v1448_v36  ;;  %v1712_v34 = vld [vmem:[%s2603_s4 + $0x78] sm:$0xff]  ;;  %v1590_v36 = vlaneseq }
 0x55a   :  { %2036 = vmatprep.mubr.msk.f32.mxu0 %vm55_vm0, %v1459_v38  ;;  %v2126_v35 = vpack.c.bf16 %v1712_v34, %v1711_v33 }
 0x55b   :  { %2037 = vmatmul.mubr.msk.f32.vlgmr.msra.gmra.mrb[12].mxu0 %vm55_vm0, %v1460_v39  ;;  %v1591_v37 = vshrl.u32 %v1590_v36, 7  ;;  %v1588_v39 = vld [vmem:[%s2607_s8] sm:$0x3] }
 0x55c   :  { %2101 = vmatpush3.bf16.msra.mxu0 %v2098_v12 }
 0x55d   :  { %v1592_v38 = vsub.s32 0, %v1591_v37 }
 0x62e   :  { %v2038_v41 = vpop.f32.mrb[12].mxu0 }
 0x62f   :  { %v1550_v42 = vadd.f32 %v2038_v41, %v1867_v40  ;;  %v1544_v43 = vpop.f32.mrb[13].mxu0 }
 0x630   :  { %v1545_v15 = vadd.f32 %v1867_v40, %v1544_v43  ;;  %v1593_v40 = vrot.slane %v1588_v39, %v1592_v38 }
 0x631   :  { %v1554_v13 = vadd.f32 %v1550_v42, %v2313_v7  ;;  %v1582_v7 = vld [vmem:[%s2602_s3 + $0x10] sm:$0xff] }
 0x632   :  { %v1553_v44 = vadd.f32 %v1545_v15, %v2306_v5  ;;  %v1580_v5 = vld [vmem:[%s2602_s3] sm:$0xff] }
 0x633   :  { %v1557_v45 = vmul.f32 %v1554_v13, %v1554_v13  ;;  %v2092_v52 = vpack.c.bf16 %v1582_v7, %v1580_v5  ;;  %v1596_v7 = vsub.s32 1, %v1591_v37 }
 0x634   :  { %v1556_v46 = vmul.f32 %v1553_v44, %v1553_v44 }
 0x635   :  { %v1561_v47 = vsel %vm55_vm0, %v1557_v45, 0.0  ;;  %2093 = vmatpush1.bf16.msra.mxu1 %v2092_v52  ;;  %v1597_v52 = vrot.slane %v1588_v39, %v1596_v7 }
 0x636   :  { %1562 = vadd.xlane.f32.xlu1 %v1561_v47  ;;  %v1558_v48 = vsel %vm55_vm0, %v1556_v46, 0.0  ;;  %2095 = vmatprep.subr.bf16.mxu1 %v2094_v55 }
 0x637   :  { %1559 = vadd.xlane.f32.xlu0 %v1558_v48 }
 0x639   :  { %2097 = vmatpush1.bf16.msra.mxu1 %v2096_v57 }
 0x6c3   :  { %v1563_v58 = vpop.xlane.xlu1 %1562 }
 0x6c4   :  { %v1565_v59 = vmul.f32 0.03125, %v1563_v58  ;;  %v1560_v60 = vpop.xlane.xlu0 %1559 }
 0x6c5   :  { %v1564_v61 = vmul.f32 0.03125, %v1560_v60  ;;  %v1873_v60 = vld [vmem:[%s2608_s9] ss:$0 sm:$0xff] }
 0x6c6   :  { %v1567_v62 = vadd.f32 1e-08, %v1565_v59 }
 0x6c7   :  { %v1566_v63 = vadd.f32 1e-08, %v1564_v61 }
 0x6c8   :  { %2174 = vrsqrt.f32 %v1567_v62 }
 0x6c9   :  { %2176 = vrsqrt.f32 %v1566_v63 }
 0x6d2   :  { %v2175_v0 = vpop.eup %2174 }
 0x6d3   :  { %v2177_v1 = vpop.eup %2176  ;;  %v1571_v6 = vmul.f32 %v2175_v0, %v1554_v13 }
 0x6d4   :  { %v1570_v3 = vmul.f32 %v2177_v1, %v1553_v44 }
 0x6d5   :  { %v2519_v9 = vmul.f32 %v1870_v2, %v1571_v6 }
 0x6d6   :  { %v2514_v4 = vmul.f32 %v1870_v2, %v1570_v3 }
 0x6d8   :  { %1871 = vmatmul.mubr.msk.f32.vlgmr.msra.gmra.mrb[22].mxu1 %vm55_vm0, %v2514_v4 }
 0x6d9   :  { %1676 = vmatprep.mubr.f32.mxu1 %v2214_v8  ;;  %v1699_v8 = vld [vmem:[%s2603_s4 + $0x10] sm:$0xff] }
 0x6da   :  { %v2102_v16 = vpack.c.bf16 %v1700_v14, %v1699_v8 }
 0x6dc   :  { %1872 = vmatmul.mubr.msk.f32.gmra.mrb[24].mxu1 %vm55_vm0, %v2519_v9  ;;  %2103 = vmatprep.subr.bf16.mxu0 %v2102_v16 }
 0x6dd   :  { %2105 = vmatpush3.bf16.msra.mxu0 %v2102_v16 }
 0x6de   :  { %2107 = vmatprep.subr.bf16.mxu0 %v2106_v20 }
 0x6e1   :  { %2109 = vmatpush3.bf16.msra.mxu0 %v2106_v20 }
 0x6e2   :  { %2111 = vmatprep.subr.bf16.mxu0 %v2110_v23 }
 0x6e5   :  { %2113 = vmatpush3.bf16.msra.mxu0 %v2110_v23 }
 0x6e6   :  { %2115 = vmatprep.subr.bf16.mxu0 %v2114_v26 }
 0x6e9   :  { %2117 = vmatpush3.bf16.msra.mxu0 %v2114_v26 }
 0x6ea   :  { %2119 = vmatprep.subr.bf16.mxu0 %v2118_v29 }
 0x6ed   :  { %2121 = vmatpush3.bf16.msra.mxu0 %v2118_v29 }
 0x6ee   :  { %2123 = vmatprep.subr.bf16.mxu0 %v2122_v32 }
 0x6f1   :  { %2125 = vmatpush3.bf16.msra.mxu0 %v2122_v32 }
 0x6f2   :  { %2127 = vmatprep.subr.bf16.mxu0 %v2126_v35 }
 0x6f5   :  { %2129 = vmatpush3.bf16.msra.mxu0 %v2126_v35 }
 0x7ab   :  { %v1672_v41 = vpop.f32.mrb[22].mxu1 }
 0x7ac   :  { %v1673_v42 = vadd.f32 %v1672_v41, %v1593_v40  ;;  %v1674_v43 = vpop.f32.mrb[23].mxu1 }
 0x7ad   :  { %v1675_v55 = vadd.f32 %v1674_v43, %v1597_v52 }
 0x7ae   :  { %v1683_v15 = vsub.f32 0.0, %v1673_v42 }
 0x7af   :  { %v1678_v13 = vpop.f32.mrb[24].mxu1 }
 0x7b0   :  { %v1685_v44 = vmul.f32 1.442695, %v1683_v15  ;;  %v1679_v45 = vadd.f32 %v1678_v13, %v1593_v40  ;;  %v1680_v46 = vpop.f32.mrb[25].mxu1 }
 0x7b1   :  { %v1681_v58 = vadd.f32 %v1680_v46, %v1597_v52 }
 0x7b2   :  { %2178 = vpow2.f32 %v1685_v44  ;;  %v1684_v47 = vsub.f32 0.0, %v1679_v45 }
 0x7b4   :  { %v1687_v48 = vmul.f32 1.442695, %v1684_v47 }
 0x7b6   :  { %2180 = vpow2.f32 %v1687_v48 }
 0x7bc   :  { %v2179_v49 = vpop.eup %2178 }
 0x7bd   :  { %v1689_v50 = vadd.f32 1.0, %v2179_v49 }
 0x7bf   :  { %2182 = vrcp.f32 %v1689_v50 }
 0x7c0   :  { %v2181_v51 = vpop.eup %2180 }
 0x7c1   :  { %v1690_v5 = vadd.f32 1.0, %v2181_v51 }
 0x7c3   :  { %2184 = vrcp.f32 %v1690_v5 }
 0x7c9   :  { %v2183_v53 = vpop.eup %2182 }
 0x7ca   :  { %v1693_v54 = vmul.f32 %v2183_v53, %v1673_v42 }
 0x7cc   :  { %v1695_v17 = vmul.f32 %v1693_v54, %v1675_v55 }
 0x7cd   :  { %v2185_v56 = vpop.eup %2184 }
 0x7ce   :  { %v1694_v57 = vmul.f32 %v2185_v56, %v1679_v45  ;;  %2071 = vmatprep.mubr.f32.mxu0 %v1695_v17 }
 0x7d0   :  { %v1696_v59 = vmul.f32 %v1694_v57, %v1681_v58 }
 0x7d2   :  { %2072 = vmatmul.mubr.f32.vlgmr.msra.gmra.mrb[14].mxu0 %v1696_v59 }
 0x8a5   :  { %v2073_v61 = vpop.f32.mrb[14].mxu0 }
 0x8a6   :  { %v1792_v62 = vadd.f32 %v2073_v61, %v1873_v60  ;;  %v1786_v63 = vpop.f32.mrb[15].mxu0 }
 0x8a7   :  { %v1787_v0 = vadd.f32 %v1873_v60, %v1786_v63 }
 0x8a8   :  { %v1796_v1 = vadd.f32 %v1792_v62, %v2519_v9 }
 0x8a9   :  { %v1795_v2 = vadd.f32 %v1787_v0, %v2514_v4  ;;  %v1874_v4 = vld [vmem:[%s2610_s11] ss:$0 sm:$0xff] }
 0x8aa   :  { %v1799_v10 = vmul.f32 %v1796_v1, %v1796_v1 }
 0x8ab   :  { %v1798_v3 = vmul.f32 %v1795_v2, %v1795_v2 }
 0x8ac   :  { %v1803_v11 = vsel %vm55_vm0, %v1799_v10, 0.0 }
 0x8ad   :  { %v1800_v6 = vsel %vm55_vm0, %v1798_v3, 0.0 }
 0x8ae   :  { %1801 = vadd.xlane.f32.xlu0 %v1800_v6 }
 0x8b2   :  { %1804 = vadd.xlane.f32.xlu0 %v1803_v11 }
 0x93b   :  { %v1802_v12 = vpop.xlane.xlu0 %1801 }
 0x93c   :  { %v1806_v8 = vmul.f32 0.03125, %v1802_v12 }
 0x93e   :  { %v1808_v14 = vadd.f32 1e-08, %v1806_v8 }
 0x93f   :  { %v1805_v16 = vpop.xlane.xlu0 %1804 }
 0x940   :  { %2186 = vrsqrt.f32 %v1808_v14  ;;  %v1807_v18 = vmul.f32 0.03125, %v1805_v16 }
 0x942   :  { %v1809_v19 = vadd.f32 1e-08, %v1807_v18 }
 0x944   :  { %2188 = vrsqrt.f32 %v1809_v19 }
 0x94a   :  { %v2187_v20 = vpop.eup %2186 }
 0x94b   :  { %v1812_v9 = vmul.f32 %v2187_v20, %v1795_v2 }
 0x94d   :  { %v1820_v21 = vmul.f32 %v1874_v4, %v1812_v9 }
 0x94e   :  { %v2189_v22 = vpop.eup %2188 }
 0x94f   :  { %v1813_v23 = vmul.f32 %v2189_v22, %v1796_v1  ;;  %1822 = vst.msk [vmem:[#allocation2] sm:$0xff] %vm55_vm0, %v1820_v21 }
 0x951   :  { %v1821_v24 = vmul.f32 %v1874_v4, %v1813_v23 }
 0x953   :  { %1823 = vst.msk [vmem:[#allocation2 + $0x8] sm:$0xff] %vm55_vm0, %v1821_v24 }
 0x954   :  { %2201 = shalt.err (!%p2198_p4)
}
 0x955   :  { %s2202_s17 = scalar_lea.hbm %s2611_s12, 256 }
 0x956   :  { %p2203_p5 = scmp.ne.s32.totalorder %s2611_s12, %s2202_s17  ;;  %p2206_p6 = scmp.lt.u32.totalorder %s2202_s17, %s2611_s12 }
 0x958   :  { %p2208_p7 = pnand %p2206_p6, %p2203_p5 }
 0x95a   :  { %2211 = shalt.err (!%p2208_p7)
}
 0x95b   :  { %s2225_s22 = smov 128  }
 0x95c   :  { %1835 = dma.vmem_to_hbm [thread:$0]  %s1830_s0, 256, %s2611_s12, [#allocation3], %s2225_s22, %s2225_s22, %s2221_s20  }
 0x95d   :  { %2212 = dma.done.wait [#allocation3], 256  }
 0x95e   :  { %2213 = vsyncadd [#allocation3], 4294967040 }
 0x95f   :  { %1839 = vsyncpa [#allocation3], 1 }

</bundles_post_ra>
